<compile_context>
chip_gen: v5e
topology: v5e:2x2
jax: 0.10.0
libtpu: 0.0.40
codegen_flags: <defaults>
</compile_context>

<pallas_src>
import jax
import jax.numpy as jnp
from jax.experimental import pallas as pl
from jax.experimental.pallas import tpu as pltpu


# Lanes (batch columns) per grid step. A (7, 32768) f32 block is ~0.9 MiB
# (~1.8 MiB double-buffered): well under the scoped-VMEM default on every
# generation, and big enough that per-step HBM DMA time dwarfs the ~0.35 us
# grid-step overhead on v5e/v6e. On v7x (3.2 TB/s HBM) sweep up to ~128K.
TB_DEFAULT = 32768


def _round_up(n: int, m: int) -> int:
    return ((n + m - 1) // m) * m


def fraudfit_kernel(x_ref, w1_ref, b1_ref, w2_ref, b2_ref, o_ref):
    # x_ref: (7, TB); w1_ref: (4, 7); b1_ref: (4, 1); w2_ref: (1, 4); b2_ref: (1, 1)
    x = x_ref[...]
    # hidden = sigmoid(W1 @ x + b1)  -> (4, TB), lane-dense
    h = jnp.dot(w1_ref[...], x, preferred_element_type=jnp.float32) + b1_ref[...]
    # sigmoid = 1 / (1 + exp(-h)): exp and the approximate reciprocal both live
    # in the EUP bundle slot, keeping VALU slots free (kernel is HBM-bound anyway).
    h = pl.reciprocal(1.0 + jnp.exp(-h), approx=True)
    # out = W2 @ h + b2              -> (1, TB), lane-dense full-width store
    o = jnp.dot(w2_ref[...], h, preferred_element_type=jnp.float32) + b2_ref[...]
    o_ref[...] = o.astype(o_ref.dtype)


def fraudfit_forward(x, w1, b1, w2, b2, *, tb: int = TB_DEFAULT):
    """x: (B, 7) f32; w1: (4, 7); b1: (4, 1); w2: (1, 4); b2: (1, 1).
    Returns (B, 1) f32, matching FraudFit.forward."""
    B = x.shape[0]
    # Lane-dense orientation: batch on the last dim. (In a real pipeline, feed
    # the data already transposed instead of paying this XLA transpose.)
    x_t = x.T                                          # (7, B)
    tb = min(tb, _round_up(B, 128))                    # don't over-allocate tiny batches
    Bp = _round_up(B, tb)                              # pad batch to a whole number of tiles
    if Bp != B:
        x_t = jnp.pad(x_t, ((0, 0), (0, Bp - B)))      # pad lanes; sliced off below

    out_t = pl.pallas_call(
        fraudfit_kernel,
        out_shape=jax.ShapeDtypeStruct((1, Bp), jnp.float32),
        grid=(Bp // tb,),
        in_specs=[
            pl.BlockSpec((7, tb), lambda i: (0, i)),   # x tile: pipelined / double-buffered
            pl.BlockSpec((4, 7), lambda i: (0, 0)),    # weights & biases: constant index
            pl.BlockSpec((4, 1), lambda i: (0, 0)),    #   maps -> DMA'd once, stay resident
            pl.BlockSpec((1, 4), lambda i: (0, 0)),
            pl.BlockSpec((1, 1), lambda i: (0, 0)),
        ],
        out_specs=pl.BlockSpec((1, tb), lambda i: (0, i)),
        compiler_params=pltpu.CompilerParams(
            dimension_semantics=("parallel",),         # shard batch grid across TCs (v7x)
        ),
    )(x_t, w1, b1, w2, b2)

    return out_t[:, :B].T                              # back to (B, 1)


def init_params(key):
    """PyTorch nn.Linear default init: U(-1/sqrt(fan_in), 1/sqrt(fan_in)).
    Weights kept in PyTorch's [out, in] layout (kernel computes W @ x)."""
    k1, k2, k3, k4 = jax.random.split(key, 4)
    bound1 = 1.0 / jnp.sqrt(7.0)
    bound2 = 1.0 / jnp.sqrt(4.0)
    w1 = jax.random.uniform(k1, (4, 7), jnp.float32, -bound1, bound1)
    b1 = jax.random.uniform(k2, (4, 1), jnp.float32, -bound1, bound1)
    w2 = jax.random.uniform(k3, (1, 4), jnp.float32, -bound2, bound2)
    b2 = jax.random.uniform(k4, (1, 1), jnp.float32, -bound2, bound2)
    return w1, b1, w2, b2


if __name__ == "__main__":
    key = jax.random.PRNGKey(0)
    kx, kp = jax.random.split(key)

    B = 8
    x = jax.random.normal(kx, (B, 7), dtype=jnp.float32)
    w1, b1, w2, b2 = init_params(kp)

    out = jax.block_until_ready(fraudfit_forward(x, w1, b1, w2, b2))

    # Reference in plain JAX (same math as the PyTorch forward).
    ref = jax.nn.sigmoid(x @ w1.T + b1.reshape(1, -1)) @ w2.T + b2.reshape(1, 1)
    assert out.shape == (B, 1)
    # Kernel uses the EUP approximate reciprocal for sigmoid -> slightly looser tol.
    assert jnp.allclose(out, ref, atol=5e-3, rtol=5e-3), (out, ref)

    print("KERNEL_OK")
</pallas_src>

<mosaic_0001>
module attributes {stable_mosaic.version = 11 : i64} {
  func.func @fraudfit_kernel(%arg0: i32, %arg1: memref<7x128xf32, #tpu.memory_space<vmem>>, %arg2: memref<4x7xf32, #tpu.memory_space<vmem>>, %arg3: memref<4x1xf32, #tpu.memory_space<vmem>>, %arg4: memref<1x4xf32, #tpu.memory_space<vmem>>, %arg5: memref<1x1xf32, #tpu.memory_space<vmem>>, %arg6: memref<1x128xf32, #tpu.memory_space<vmem>>) attributes {dimension_semantics = [#tpu.dimension_semantics<parallel>], iteration_bounds = array<i64: 1>, scalar_prefetch = 0 : i64, scratch_operands = 0 : i64, tpu.core_type = #tpu.core_type<tc>, window_params = [{transform_indices = @transform_0, window_bounds = array<i64: 7, 128>}, {pipeline_mode = #tpu.pipeline_mode<synchronous>, transform_indices = @transform_1, window_bounds = array<i64: 4, 7>}, {pipeline_mode = #tpu.pipeline_mode<synchronous>, transform_indices = @transform_2, window_bounds = array<i64: 4, 1>}, {pipeline_mode = #tpu.pipeline_mode<synchronous>, transform_indices = @transform_3, window_bounds = array<i64: 1, 4>}, {pipeline_mode = #tpu.pipeline_mode<synchronous>, transform_indices = @transform_4, window_bounds = array<i64: 1, 1>}, {transform_indices = @transform_5, window_bounds = array<i64: 1, 128>}]} {
    %c0 = arith.constant 0 : index
    %c0_0 = arith.constant 0 : index
    %0 = vector.load %arg1[%c0, %c0_0] : memref<7x128xf32, #tpu.memory_space<vmem>>, vector<7x128xf32>
    %c0_1 = arith.constant 0 : index
    %c0_2 = arith.constant 0 : index
    %1 = vector.load %arg2[%c0_1, %c0_2] : memref<4x7xf32, #tpu.memory_space<vmem>>, vector<4x7xf32>
    %cst = arith.constant dense<0.000000e+00> : vector<4x128xf32>
    %2 = tpu.matmul %1, %0, %cst {dimension_numbers = #tpu.dot_dimension_numbers<[1], [0], [0], [1], [0, 0, 1, 1], [], []>} : vector<4x7xf32>, vector<7x128xf32>, vector<4x128xf32> -> vector<4x128xf32>
    %c0_3 = arith.constant 0 : index
    %c0_4 = arith.constant 0 : index
    %3 = vector.load %arg3[%c0_3, %c0_4] : memref<4x1xf32, #tpu.memory_space<vmem>>, vector<4x1xf32>
    %4 = vector.broadcast %3 : vector<4x1xf32> to vector<4x128xf32>
    %5 = arith.addf %2, %4 : vector<4x128xf32>
    %cst_5 = arith.constant 0.000000e+00 : f32
    %6 = vector.broadcast %cst_5 : f32 to vector<4x128xf32>
    %7 = arith.subf %6, %5 : vector<4x128xf32>
    %8 = math.exp %7 : vector<4x128xf32>
    %cst_6 = arith.constant 1.000000e+00 : f32
    %9 = vector.broadcast %cst_6 : f32 to vector<4x128xf32>
    %10 = arith.addf %9, %8 : vector<4x128xf32>
    %11 = tpu.reciprocal %10 {approx = true} : vector<4x128xf32> -> vector<4x128xf32>
    %c0_7 = arith.constant 0 : index
    %c0_8 = arith.constant 0 : index
    %12 = vector.load %arg4[%c0_7, %c0_8] : memref<1x4xf32, #tpu.memory_space<vmem>>, vector<1x4xf32>
    %cst_9 = arith.constant dense<0.000000e+00> : vector<1x128xf32>
    %13 = tpu.matmul %12, %11, %cst_9 {dimension_numbers = #tpu.dot_dimension_numbers<[1], [0], [0], [1], [0, 0, 1, 1], [], []>} : vector<1x4xf32>, vector<4x128xf32>, vector<1x128xf32> -> vector<1x128xf32>
    %c0_10 = arith.constant 0 : index
    %c0_11 = arith.constant 0 : index
    %14 = vector.load %arg5[%c0_10, %c0_11] : memref<1x1xf32, #tpu.memory_space<vmem>>, vector<1x1xf32>
    %15 = vector.broadcast %14 : vector<1x1xf32> to vector<1x128xf32>
    %16 = arith.addf %13, %15 : vector<1x128xf32>
    %c0_12 = arith.constant 0 : index
    %c0_13 = arith.constant 0 : index
    %17 = vector.load %arg6[%c0_12, %c0_13] : memref<1x128xf32, #tpu.memory_space<vmem>>, vector<1x128xf32>
    tpu.vector_store %arg6[%c0_12, %c0_13], %16 {strides = array<i32>} : memref<1x128xf32, #tpu.memory_space<vmem>>, vector<1x128xf32>,
    return
  }
  func.func @transform_0(%arg0: i32) -> (i32, i32) {
    %c0_i32 = arith.constant 0 : i32
    %c0_i32_0 = arith.constant 0 : i32
    return %c0_i32, %arg0 : i32, i32
  }
  func.func @transform_1(%arg0: i32) -> (i32, i32) {
    %c0_i32 = arith.constant 0 : i32
    %c0_i32_0 = arith.constant 0 : i32
    %c0_i32_1 = arith.constant 0 : i32
    return %c0_i32, %c0_i32_0 : i32, i32
  }
  func.func @transform_2(%arg0: i32) -> (i32, i32) {
    %c0_i32 = arith.constant 0 : i32
    %c0_i32_0 = arith.constant 0 : i32
    %c0_i32_1 = arith.constant 0 : i32
    return %c0_i32, %c0_i32_0 : i32, i32
  }
  func.func @transform_3(%arg0: i32) -> (i32, i32) {
    %c0_i32 = arith.constant 0 : i32
    %c0_i32_0 = arith.constant 0 : i32
    %c0_i32_1 = arith.constant 0 : i32
    return %c0_i32, %c0_i32_0 : i32, i32
  }
  func.func @transform_4(%arg0: i32) -> (i32, i32) {
    %c0_i32 = arith.constant 0 : i32
    %c0_i32_0 = arith.constant 0 : i32
    %c0_i32_1 = arith.constant 0 : i32
    return %c0_i32, %c0_i32_0 : i32, i32
  }
  func.func @transform_5(%arg0: i32) -> (i32, i32) {
    %c0_i32 = arith.constant 0 : i32
    %c0_i32_0 = arith.constant 0 : i32
    return %c0_i32, %arg0 : i32, i32
  }
}

</mosaic_0001>

<bundles_post_ra>
// kernel: tpu_custom_call.1
= control target key start
LH: loop header
LB: loop body
LE: loop exit
PB: predicated region body
PF: predicated region fallthrough
CT: control target
= control target key end

     0   :  { %s247_s0 = inlined_call_operand.hbm [shape: f32[7,128], index: 0, kind: input, shape index: {}]   ;;  %s248_s1 = inlined_call_operand.vmem [shape: f32[4,7], index: 1, kind: input, shape index: {}]   ;;  %s249_s2 = inlined_call_operand.vmem [shape: f32[4,1], index: 2, kind: input, shape index: {}]   ;;  %s250_s3 = inlined_call_operand.vmem [shape: f32[1,4], index: 3, kind: input, shape index: {}]   ;;  %s251_s4 = inlined_call_operand.<no memory space> [shape: f32[1,1], index: 4, kind: input, shape index: {}]   ;;  %s252_s5 = inlined_call_operand.hbm [shape: f32[1,128], index: 5, kind: output, shape index: {}]  }
   0x1   :  { %v10_v0 = vstv %s251_s4 }
   0x2   :  { %11 = vst [vmem:[#allocation2] sm:$0x1] %v10_v0 }
   0x3   :  { %12 = vsyncpa [#allocation4], 0 }
   0x4   :  { %13 = vsyncpa [#allocation5], 0  ;;  %s19_s22 = sshll.u32 %s247_s0, 4  ;;  %s196_s23 = smov [#allocation3]   ;;  %s20_s22 = int_to_ptr.hbm [resolvable:$true] %s19_s22 }
   0x5   :  { %s21_s24 = sshll.u32 %s196_s23, 4  ;;  %s22_s24 = int_to_ptr.vmem [resolvable:$true] %s21_s24 }
   0x6   :  { %24 = dma.hbm_to_vmem [thread:$0]  %s20_s22, 128, %s22_s24, [#allocation4]  }
   0x7   :  { %192 = dma.done.wait [#allocation4], 128  }
   0x8   :  { %193 = vsyncadd [#allocation4], 4294967168  ;;  %v197_v1 = vmov 0   ;;  %vm49_vm0 = vcmask 1046528   ;;  %vm45_vm1 = vcmask 56320   ;;  %vm90_vm2 = vcmask 1043456  }
   0x9   :  { %139 = vset.pattern.permute.xlu0 %v197_v1  ;;  %v37_v2 = vld [vmem:[#allocation3] sm:$0x7f]  ;;  %v79_v5 = vld [vmem:[#allocation2] sm:$0x1]  ;;  %vm86_vm3 = vcmask 31744   ;;  %s122_s6 = sshll.u32 %s252_s5, 4  ;;  %s123_s6 = int_to_ptr.hbm [resolvable:$true] %s122_s6 }
   0xa   :  { %v38_v3 = vld [vmem:[%s248_s1] sm:$0xf]  ;;  %132 = vmatpush.msk.msra.mxu0 %vm49_vm0, %v37_v2 }
   0xb   :  { %v39_v4 = vld [vmem:[%s249_s2] sm:$0xf]  ;;  %133 = vmatmul.msk.f32.vlgmr.msra.gmra.mxu0 %vm45_vm1, %v38_v3  ;;  %s198_s2 = smov [#allocation6]  }
   0xc   :  { %42 = vperm.xlu0 %139, %v39_v4   ;;  %v78_v13 = vld [vmem:[%s250_s3] sm:$0x1]  ;;  %s120_s28 = sshll.u32 %s198_s2, 4  ;;  %s121_s28 = int_to_ptr.vmem [resolvable:$true] %s120_s28 }
  0x14   :  { %82 = vperm.xlu0 %139, %v79_v5  }
  0x7e   :  { %v43_v6 = vpop.permute.xlu0 %42 }
  0x86   :  { %v83_v15 = vpop.permute.xlu0 %82 }
  0x87   :  { %v85_v16 = vperm.slane %v83_v15, 0 }
  0x88   :  { %v70_v7 = vpop.f32.mrf.mxu0 }
  0x89   :  { %v71_v8 = vadd.f32 %v70_v7, %v43_v6 }
  0x8b   :  { %v73_v9 = vsub.f32 0.0, %v71_v8 }
  0x8d   :  { %v74_v10 = vmul.f32 1.442695, %v73_v9 }
  0x8f   :  { %140 = vpow2.f32 %v74_v10 }
  0x95   :  { %v141_v11 = vpop.eup %140 }
  0x96   :  { %v76_v12 = vadd.f32 1.0, %v141_v11 }
  0x98   :  { %142 = vrcp.f32 %v76_v12 }
  0x9e   :  { %v143_v14 = vpop.eup %142 }
  0x9f   :  { %134 = vmatpush.msk.msra.mxu1 %vm90_vm2, %v143_v14 }
  0xa0   :  { %135 = vmatmul.msk.f32.vlgmr.msra.gmra.mxu1 %vm86_vm3, %v78_v13 }
 0x11d   :  { %v111_v17 = vpop.f32.mrf.mxu1 }
 0x11e   :  { %v112_v18 = vadd.f32 %v111_v17, %v85_v16 }
 0x120   :  { %114 = vst [vmem:[#allocation6] sm:$0x1] %v112_v18 }
 0x121   :  { %125 = dma.vmem_to_hbm [thread:$0]  %s121_s28, 16, %s123_s6, [#allocation5]  }
 0x122   :  { %194 = dma.done.wait [#allocation5], 16  }
 0x123   :  { %195 = vsyncadd [#allocation5], 4294967280 }
 0x124   :  { %130 = vsyncpa [#allocation4], 1 }
 0x125   :  { %131 = vsyncpa [#allocation5], 1 }

</bundles_post_ra>
